<compile_context>
chip_gen: v7x
topology: tpu7x:2x2x1
jax: 0.10.0
libtpu: 0.0.40
codegen_flags: <defaults>
</compile_context>

<pallas_src>
import numpy as np
import jax
import jax.numpy as jnp
from jax.experimental import pallas as pl
from jax.experimental.pallas import tpu as pltpu

EPS = 1e-6  # torch.pairwise_distance default eps


def _round_up(a, b):
    return -(-a // b) * b


def _pick_tiles(n, d):
    """Choose (tm, tn, tk, n_pad, d_pad)."""
    # lane tile for the streamed "other" rows
    tn = 128 if _round_up(max(n, 1), 128) <= 128 else 256
    n_pad = _round_up(n, tn)

    # feature chunking: bound the streamed operand's K chunk
    tk = d if d <= 512 else 512
    d_pad = _round_up(d, tk)

    # anchor tile: as large as possible (arithmetic intensity ~ tm flop/byte), but
    #  - must divide n_pad exactly,
    #  - the resident, double-buffered bf16 anchor block must fit a ~24 MiB VMEM budget
    #    (safe on v5e/v6e 128 MiB and v7x 64 MiB),
    #  - keep >= 2 i-tiles so the "parallel" axis can split across v7x's two TensorCores.
    vmem_budget = 24 << 20
    tm_vmem_cap = max(128, (vmem_budget // (4 * d_pad)) // 128 * 128)
    tm = tn
    for cand in (256, 512, 768, 1024):
        if cand > tm_vmem_cap:
            break
        if n_pad % cand == 0 and n_pad // cand >= 2:
            tm = cand
    tm = min(tm, n_pad)
    return tm, tn, tk, n_pad, d_pad


def _make_kernel(margin, tk, num_k):
    margin = float(margin)  # Python scalars -> jaxpr literals (never captured consts)

    def kernel(x_i_ref, xt_ref, ct_ref, rt_ref, out_d_ref, out_h_ref, *scratch):
        if num_k == 1:
            acc_d, acc_h = scratch
        else:
            gram, acc_d, acc_h = scratch

        j = pl.program_id(1)
        k = pl.program_id(2)
        nj = pl.num_programs(1)

        # ---- start of an anchor tile's (j, k) sweep ----
        @pl.when((j == 0) & (k == 0))
        def _init_sweep():
            acc_d[...] = jnp.zeros_like(acc_d)
            acc_h[...] = jnp.zeros_like(acc_h)

        # ---- Gram partial product on the MXU (bf16 in, f32 accumulate) ----
        # streamed operand already holds (-2 * x)^T, so "gram" is -2 * <x_i, x_j>.
        if num_k == 1:
            g_full = jnp.dot(x_i_ref[...], xt_ref[...],
                             preferred_element_type=jnp.float32)
        else:
            @pl.when(k == 0)
            def _init_gram():
                gram[...] = jnp.zeros_like(gram)

            off = pl.multiple_of(k * tk, tk)
            gram[...] += jnp.dot(x_i_ref[:, pl.ds(off, tk)], xt_ref[...],
                                 preferred_element_type=jnp.float32)

        # ---- per-(i, j) tile epilogue, once the K sweep is complete ----
        @pl.when(k == num_k - 1)
        def _tile_epilogue():
            gm = g_full if num_k == 1 else gram[...]
            # dist2 = ||xi||^2 + ||xj||^2 - 2<xi,xj> + 2 eps (sum xi - sum xj) + d eps^2
            # (norm / eps / d*eps^2 terms folded into ct/rt by the wrapper).  Clamp at 0:
            # torch's direct (diff + eps)^2 form is always >= 0, the Gram expansion can
            # cancel slightly below 0.
            dist2 = jnp.maximum(ct_ref[...] + rt_ref[...] + gm, 0.0)
            acc_d[...] += dist2                               # VALU only
            acc_h[...] += jnp.maximum(margin - dist2, 0.0)    # VALU only

        # ---- finalize the anchor tile: one cross-lane reduction per i sweep ----
        @pl.when((k == num_k - 1) & (j == nj - 1))
        def _finalize():
            # TODO(synk): optionally emit a lane-dense (1, tm) output instead of (tm, 1)
            # to avoid the masked 1-lane writeback (tiny, once per anchor tile).
            out_d_ref[...] = jnp.sum(acc_d[...], axis=-1, keepdims=True)
            out_h_ref[...] = jnp.sum(acc_h[...], axis=-1, keepdims=True)

    return kernel


def contrastive_loss(inputs, targets, margin=0.5):
    """inputs: (N, D) float, targets: (N,) int labels -> scalar float32 loss."""
    x = jnp.asarray(inputs)
    lbl = jnp.asarray(targets)
    n, d = x.shape

    tm, tn, tk, n_pad, d_pad = _pick_tiles(n, d)
    num_k = d_pad // tk

    xf = x.astype(jnp.float32)
    if n_pad != n or d_pad != d:
        xf = jnp.pad(xf, ((0, n_pad - n), (0, d_pad - d)))

    # Quantize the embeddings once to bf16 (MXU-native).  Norms / eps terms are computed
    # from the SAME quantized values in f32, so the Gram expansion stays self-consistent
    # (diagonal ~ d*eps^2, dist2 >= 0 up to f32 rounding).
    xb = xf.astype(jnp.bfloat16)            # (n_pad, d_pad) bf16  — anchor (LHS) operand
    xb32 = xb.astype(jnp.float32)
    x_rhs = jnp.transpose((-2.0 * xb32).astype(jnp.bfloat16))   # (d_pad, n_pad), -2 folded in (exact)

    # tiny O(N*D) f32 prologue: fold norms + pairwise_distance eps cross-terms + d*eps^2
    sq = jnp.sum(xb32 * xb32, axis=1)
    s = jnp.sum(xb32, axis=1)
    col_term = (sq + (2.0 * EPS) * s + float(d) * EPS * EPS).reshape(n_pad, 1)
    row_term = (sq - (2.0 * EPS) * s).reshape(1, n_pad)
    col_term = col_term.astype(jnp.float32)
    row_term = row_term.astype(jnp.float32)

    grid = (n_pad // tm, n_pad // tn, num_k)
    n_scratch = 2 if num_k == 1 else 3

    out_d, out_h = pl.pallas_call(
        _make_kernel(float(margin), int(tk), int(num_k)),
        out_shape=(jax.ShapeDtypeStruct((n_pad, 1), jnp.float32),
                   jax.ShapeDtypeStruct((n_pad, 1), jnp.float32)),
        grid_spec=pltpu.PrefetchScalarGridSpec(
            num_scalar_prefetch=0,
            grid=grid,
            in_specs=[
                # resident anchor rows: block index ignores j and k -> fetched once per i
                # TODO(synk): try pipeline_mode=pl.Buffered(1) here on v7x when tm*D is large.
                pl.BlockSpec((tm, d_pad), lambda i, j, k: (i, 0)),
                # streamed, pre-transposed, pre-scaled (-2 x)^T chunks: (K, N) MXU-native
                pl.BlockSpec((tk, tn), lambda i, j, k: (k, j)),
                pl.BlockSpec((tm, 1), lambda i, j, k: (i, 0)),   # ||xi||^2 + eps + d eps^2
                pl.BlockSpec((1, tn), lambda i, j, k: (0, j)),   # ||xj||^2 - eps term
            ],
            out_specs=[pl.BlockSpec((tm, 1), lambda i, j, k: (i, 0)),
                       pl.BlockSpec((tm, 1), lambda i, j, k: (i, 0))],
            scratch_shapes=[pltpu.VMEM((tm, tn), jnp.float32)] * n_scratch,
        ),
        compiler_params=pltpu.CompilerParams(
            dimension_semantics=("parallel", "arbitrary", "arbitrary"),
            vmem_limit_bytes=48 << 20,   # < v7x 64 MiB physical, comfortable headroom
        ),
    )(xb, x_rhs, col_term, row_term)

    # ---- XLA epilogue: padded-column correction + label weighting (hoisted from kernel) ----
    # A padded column b has x_b = 0 -> gram = 0 and row_term = 0 exactly, so its dist2 is
    # max(col_term_a, 0); subtract its contribution analytically (bit-identical f32 ops).
    pad_cols = float(n_pad - n)
    ct_real = col_term[:n, 0]
    pad_d2 = jnp.maximum(ct_real, 0.0)
    row_d = out_d[:n, 0] - pad_cols * pad_d2
    row_h = out_h[:n, 0] - pad_cols * jnp.maximum(margin - pad_d2, 0.0)

    # c_pos(i) = #{j : t[j] == t[i]} over real rows; c_neg = n - c_pos.
    # TODO(synk): for very large N compute c_pos blockwise to avoid the O(N^2) bool matrix.
    lbl_i = lbl[:n].astype(jnp.int32)
    c_pos = jnp.sum((lbl_i[:, None] == lbl_i[None, :]).astype(jnp.float32), axis=1)
    c_neg = float(n) - c_pos

    return jnp.sum(c_pos * row_d + c_neg * row_h) / n


def _reference_loss(x, t, margin=0.5):
    """Pure-numpy transcription of the PyTorch forward (incl. masked_select broadcast)."""
    x = np.asarray(x, dtype=np.float64)
    t = np.asarray(t)
    n, _ = x.shape
    total = 0.0
    for i in range(n):
        diff = x[i][None, :] - x + EPS
        dist2 = np.sum(diff * diff, axis=1, keepdims=True)            # (n, 1)
        mpos = (t == t[i])                                            # (n,)
        sel = np.broadcast_to(dist2, (n, n))[np.broadcast_to(mpos[None, :], (n, n))]
        if sel.size > 0:
            total += sel.sum()
        mneg = (t != t[i])
        sel = np.broadcast_to(dist2, (n, n))[np.broadcast_to(mneg[None, :], (n, n))]
        if sel.size > 0:
            total += np.clip(margin - sel, 0.0, None).sum()
    return total / n


if __name__ == "__main__":
    key = jax.random.PRNGKey(0)
    kx, kt = jax.random.split(key)
    n, d = 8, 32
    inputs = jax.random.normal(kx, (n, d), dtype=jnp.float32)
    targets = jax.random.randint(kt, (n,), 0, 3, dtype=jnp.int32)

    loss = contrastive_loss(inputs, targets, margin=0.5)
    loss = jax.block_until_ready(loss)

    ref = _reference_loss(np.asarray(inputs), np.asarray(targets), margin=0.5)
    # bf16 Gram on the MXU -> typical relative error ~1e-3 vs the f64 reference.
    assert np.allclose(float(loss), ref, rtol=1e-2, atol=1e-2), (float(loss), ref)
    print("KERNEL_OK")
</pallas_src>

<mosaic_0001>
module attributes {stable_mosaic.version = 11 : i64} {
  func.func @kernel(%arg0: i32, %arg1: i32, %arg2: i32, %arg3: memref<128x32xbf16, #tpu.memory_space<vmem>>, %arg4: memref<32x128xbf16, #tpu.memory_space<vmem>>, %arg5: memref<128x1xf32, #tpu.memory_space<vmem>>, %arg6: memref<1x128xf32, #tpu.memory_space<vmem>>, %arg7: memref<128x1xf32, #tpu.memory_space<vmem>>, %arg8: memref<128x1xf32, #tpu.memory_space<vmem>>, %arg9: memref<128x128xf32, #tpu.memory_space<vmem>>, %arg10: memref<128x128xf32, #tpu.memory_space<vmem>>) attributes {dimension_semantics = [#tpu.dimension_semantics<parallel>, #tpu.dimension_semantics<arbitrary>, #tpu.dimension_semantics<arbitrary>], iteration_bounds = array<i64: 1, 1, 1>, scalar_prefetch = 0 : i64, scratch_operands = 2 : i64, tpu.core_type = #tpu.core_type<tc>, window_params = [{transform_indices = @transform_0, window_bounds = array<i64: 128, 32>}, {transform_indices = @transform_1, window_bounds = array<i64: 32, 128>}, {transform_indices = @transform_2, window_bounds = array<i64: 128, 1>}, {transform_indices = @transform_3, window_bounds = array<i64: 1, 128>}, {transform_indices = @transform_4, window_bounds = array<i64: 128, 1>}, {transform_indices = @transform_5, window_bounds = array<i64: 128, 1>}]} {
    %c0_i32 = arith.constant 0 : i32
    %0 = arith.cmpi eq, %arg1, %c0_i32 : i32
    %c0_i32_0 = arith.constant 0 : i32
    %1 = arith.cmpi eq, %arg2, %c0_i32_0 : i32
    %2 = arith.andi %0, %1 : i1
    %3 = arith.extui %2 : i1 to i32
    %c0_i32_1 = arith.constant 0 : i32
    %4 = arith.cmpi ne, %3, %c0_i32_1 : i32
    scf.if %4 {
      %cst_10 = arith.constant 0.000000e+00 : f32
      %16 = vector.broadcast %cst_10 : f32 to vector<128x128xf32>
      %c0_11 = arith.constant 0 : index
      %c0_12 = arith.constant 0 : index
      %17 = vector.load %arg9[%c0_11, %c0_12] : memref<128x128xf32, #tpu.memory_space<vmem>>, vector<128x128xf32>
      tpu.vector_store %arg9[%c0_11, %c0_12], %16 {strides = array<i32>} : memref<128x128xf32, #tpu.memory_space<vmem>>, vector<128x128xf32>,
      %cst_13 = arith.constant 0.000000e+00 : f32
      %18 = vector.broadcast %cst_13 : f32 to vector<128x128xf32>
      %c0_14 = arith.constant 0 : index
      %c0_15 = arith.constant 0 : index
      %19 = vector.load %arg10[%c0_14, %c0_15] : memref<128x128xf32, #tpu.memory_space<vmem>>, vector<128x128xf32>
      tpu.vector_store %arg10[%c0_14, %c0_15], %18 {strides = array<i32>} : memref<128x128xf32, #tpu.memory_space<vmem>>, vector<128x128xf32>,
    } else {
    }
    %c0 = arith.constant 0 : index
    %c0_2 = arith.constant 0 : index
    %5 = vector.load %arg3[%c0, %c0_2] : memref<128x32xbf16, #tpu.memory_space<vmem>>, vector<128x32xbf16>
    %c0_3 = arith.constant 0 : index
    %c0_4 = arith.constant 0 : index
    %6 = vector.load %arg4[%c0_3, %c0_4] : memref<32x128xbf16, #tpu.memory_space<vmem>>, vector<32x128xbf16>
    %cst = arith.constant dense<0.000000e+00> : vector<128x128xf32>
    %7 = tpu.matmul %5, %6, %cst {dimension_numbers = #tpu.dot_dimension_numbers<[1], [0], [0], [1], [0, 0, 1, 1], [], []>} : vector<128x32xbf16>, vector<32x128xbf16>, vector<128x128xf32> -> vector<128x128xf32>
    %c0_i32_5 = arith.constant 0 : i32
    %8 = arith.cmpi eq, %arg2, %c0_i32_5 : i32
    %9 = arith.extui %8 : i1 to i32
    %c0_i32_6 = arith.constant 0 : i32
    %10 = arith.cmpi ne, %9, %c0_i32_6 : i32
    scf.if %10 {
      %c0_10 = arith.constant 0 : index
      %c0_11 = arith.constant 0 : index
      %16 = vector.load %arg5[%c0_10, %c0_11] : memref<128x1xf32, #tpu.memory_space<vmem>>, vector<128x1xf32>
      %c0_12 = arith.constant 0 : index
      %c0_13 = arith.constant 0 : index
      %17 = vector.load %arg6[%c0_12, %c0_13] : memref<1x128xf32, #tpu.memory_space<vmem>>, vector<1x128xf32>
      %18 = vector.broadcast %16 : vector<128x1xf32> to vector<128x128xf32>
      %19 = vector.broadcast %17 : vector<1x128xf32> to vector<128x128xf32>
      %20 = arith.addf %18, %19 : vector<128x128xf32>
      %21 = arith.addf %20, %7 : vector<128x128xf32>
      %cst_14 = arith.constant 0.000000e+00 : f32
      %22 = vector.broadcast %cst_14 : f32 to vector<128x128xf32>
      %23 = arith.maximumf %21, %22 : vector<128x128xf32>
      %c0_15 = arith.constant 0 : index
      %c0_16 = arith.constant 0 : index
      %24 = vector.load %arg9[%c0_15, %c0_16] : memref<128x128xf32, #tpu.memory_space<vmem>>, vector<128x128xf32>
      %25 = arith.addf %24, %23 : vector<128x128xf32>
      %c0_17 = arith.constant 0 : index
      %c0_18 = arith.constant 0 : index
      %26 = vector.load %arg9[%c0_17, %c0_18] : memref<128x128xf32, #tpu.memory_space<vmem>>, vector<128x128xf32>
      tpu.vector_store %arg9[%c0_17, %c0_18], %25 {strides = array<i32>} : memref<128x128xf32, #tpu.memory_space<vmem>>, vector<128x128xf32>,
      %c0_19 = arith.constant 0 : index
      %c0_20 = arith.constant 0 : index
      %27 = vector.load %arg10[%c0_19, %c0_20] : memref<128x128xf32, #tpu.memory_space<vmem>>, vector<128x128xf32>
      %cst_21 = arith.constant 5.000000e-01 : f32
      %28 = vector.broadcast %cst_21 : f32 to vector<128x128xf32>
      %29 = arith.subf %28, %23 : vector<128x128xf32>
      %cst_22 = arith.constant 0.000000e+00 : f32
      %30 = vector.broadcast %cst_22 : f32 to vector<128x128xf32>
      %31 = arith.maximumf %29, %30 : vector<128x128xf32>
      %32 = arith.addf %27, %31 : vector<128x128xf32>
      %c0_23 = arith.constant 0 : index
      %c0_24 = arith.constant 0 : index
      %33 = vector.load %arg10[%c0_23, %c0_24] : memref<128x128xf32, #tpu.memory_space<vmem>>, vector<128x128xf32>
      tpu.vector_store %arg10[%c0_23, %c0_24], %32 {strides = array<i32>} : memref<128x128xf32, #tpu.memory_space<vmem>>, vector<128x128xf32>,
    } else {
    }
    %c0_i32_7 = arith.constant 0 : i32
    %11 = arith.cmpi eq, %arg2, %c0_i32_7 : i32
    %c0_i32_8 = arith.constant 0 : i32
    %12 = arith.cmpi eq, %arg1, %c0_i32_8 : i32
    %13 = arith.andi %11, %12 : i1
    %14 = arith.extui %13 : i1 to i32
    %c0_i32_9 = arith.constant 0 : i32
    %15 = arith.cmpi ne, %14, %c0_i32_9 : i32
    scf.if %15 {
      %c0_10 = arith.constant 0 : index
      %c0_11 = arith.constant 0 : index
      %16 = vector.load %arg9[%c0_10, %c0_11] : memref<128x128xf32, #tpu.memory_space<vmem>>, vector<128x128xf32>
      %cst_12 = arith.constant dense<0.000000e+00> : vector<128xf32>
      %17 = vector.multi_reduction <add>, %16, %cst_12 [1] : vector<128x128xf32> to vector<128xf32>
      %18 = vector.shape_cast %17 : vector<128xf32> to vector<128x1xf32>
      %c0_13 = arith.constant 0 : index
      %c0_14 = arith.constant 0 : index
      %19 = vector.load %arg7[%c0_13, %c0_14] : memref<128x1xf32, #tpu.memory_space<vmem>>, vector<128x1xf32>
      tpu.vector_store %arg7[%c0_13, %c0_14], %18 {strides = array<i32>} : memref<128x1xf32, #tpu.memory_space<vmem>>, vector<128x1xf32>,
      %c0_15 = arith.constant 0 : index
      %c0_16 = arith.constant 0 : index
      %20 = vector.load %arg10[%c0_15, %c0_16] : memref<128x128xf32, #tpu.memory_space<vmem>>, vector<128x128xf32>
      %cst_17 = arith.constant dense<0.000000e+00> : vector<128xf32>
      %21 = vector.multi_reduction <add>, %20, %cst_17 [1] : vector<128x128xf32> to vector<128xf32>
      %22 = vector.shape_cast %21 : vector<128xf32> to vector<128x1xf32>
      %c0_18 = arith.constant 0 : index
      %c0_19 = arith.constant 0 : index
      %23 = vector.load %arg8[%c0_18, %c0_19] : memref<128x1xf32, #tpu.memory_space<vmem>>, vector<128x1xf32>
      tpu.vector_store %arg8[%c0_18, %c0_19], %22 {strides = array<i32>} : memref<128x1xf32, #tpu.memory_space<vmem>>, vector<128x1xf32>,
    } else {
    }
    return
  }
  func.func @transform_0(%arg0: i32, %arg1: i32, %arg2: i32) -> (i32, i32) {
    %c0_i32 = arith.constant 0 : i32
    %c0_i32_0 = arith.constant 0 : i32
    return %arg0, %c0_i32 : i32, i32
  }
  func.func @transform_1(%arg0: i32, %arg1: i32, %arg2: i32) -> (i32, i32) {
    %c0_i32 = arith.constant 0 : i32
    return %arg2, %arg1 : i32, i32
  }
  func.func @transform_2(%arg0: i32, %arg1: i32, %arg2: i32) -> (i32, i32) {
    %c0_i32 = arith.constant 0 : i32
    %c0_i32_0 = arith.constant 0 : i32
    return %arg0, %c0_i32 : i32, i32
  }
  func.func @transform_3(%arg0: i32, %arg1: i32, %arg2: i32) -> (i32, i32) {
    %c0_i32 = arith.constant 0 : i32
    %c0_i32_0 = arith.constant 0 : i32
    return %c0_i32, %arg1 : i32, i32
  }
  func.func @transform_4(%arg0: i32, %arg1: i32, %arg2: i32) -> (i32, i32) {
    %c0_i32 = arith.constant 0 : i32
    %c0_i32_0 = arith.constant 0 : i32
    return %arg0, %c0_i32 : i32, i32
  }
  func.func @transform_5(%arg0: i32, %arg1: i32, %arg2: i32) -> (i32, i32) {
    %c0_i32 = arith.constant 0 : i32
    %c0_i32_0 = arith.constant 0 : i32
    return %arg0, %c0_i32 : i32, i32
  }
}

</mosaic_0001>

<bundles_post_ra>
// kernel: tpu_custom_call.1
= control target key start
LH: loop header
LB: loop body
LE: loop exit
PB: predicated region body
PF: predicated region fallthrough
CT: control target
= control target key end

     0   :  { %v739_v1 = vmov 0   ;;  %vm130_vm0 = vcmask 261120   ;;  %vm584_vm1 = vcmask 7168   ;;  %s1020_s1 = inlined_call_operand.vmem [shape: bf16[32,128], index: 1, kind: input, shape index: {}]   ;;  %s1021_s0 = inlined_call_operand.vmem [shape: bf16[128,32], index: 0, kind: input, shape index: {}]   ;;  %s1022_s2 = inlined_call_operand.vmem [shape: f32[128,1], index: 2, kind: input, shape index: {}]   ;;  %s1023_s3 = inlined_call_operand.vmem [shape: f32[1,128], index: 3, kind: input, shape index: {}]   ;;  %s1024_s4 = inlined_call_operand.vmem [shape: f32[128,1], index: 4, kind: output, shape index: {0}]   ;;  %s1025_s5 = inlined_call_operand.vmem [shape: f32[128,1], index: 5, kind: output, shape index: {1}]  }
   0x1   :  { %v729_v0 = vld [vmem:[%s1020_s1] sm:$0xff]   ;;  %727 = vset.pattern.permute.xlu0 %v739_v1  ;;  %728 = vset.pattern.permute.xlu1 %v739_v1  ;;  %v730_v2 = vld [vmem:[%s1020_s1 + $0x8] sm:$0xff]   ;;  %v735_v7 = vld [vmem:[%s1021_s0 + $0x10] sm:$0xff]  }
   0x2   :  { %702 = vmatprep.subr.bf16.mxu0 %v729_v0  ;;  %722 = vmatprep.subr.bf16.mxu1 %v729_v0  ;;  %v731_v3 = vld [vmem:[%s1021_s0] sm:$0xff]   ;;  %v733_v5 = vld [vmem:[%s1021_s0 + $0x8] sm:$0xff]   ;;  %v736_v8 = vld [vmem:[%s1021_s0 + $0x30] sm:$0xff]  }
   0x3   :  { %703 = vmatpush3.bf16.msra.mxu0 %v729_v0  ;;  %724 = vmatpush3.bf16.msra.mxu1 %v729_v0  ;;  %v732_v4 = vld [vmem:[%s1021_s0 + $0x20] sm:$0xff]   ;;  %v734_v6 = vld [vmem:[%s1021_s0 + $0x28] sm:$0xff]   ;;  %v257_v10 = vld [vmem:[%s1022_s2 + $0x10] sm:$0xff] }
   0x4   :  { %704 = vmatprep.subr.bf16.mxu0 %v730_v2  ;;  %723 = vmatprep.subr.bf16.mxu1 %v730_v2  ;;  %v255_v9 = vld [vmem:[%s1022_s2] sm:$0xff]  ;;  %v256_v11 = vld [vmem:[%s1022_s2 + $0x8] sm:$0xff]  ;;  %v258_v12 = vld [vmem:[%s1022_s2 + $0x18] sm:$0xff] }
   0x5   :  { %706 = vmatprep.mubr.msk.bf16.mxu0 %vm130_vm0, %v731_v3  ;;  %714 = vmatprep.mubr.msk.bf16.mxu1 %vm130_vm0, %v732_v4  ;;  %v737_v13 = vld [vmem:[%s1021_s0 + $0x18] sm:$0xff]   ;;  %v259_v15 = vld [vmem:[%s1022_s2 + $0x20] sm:$0xff]  ;;  %v260_v16 = vld [vmem:[%s1022_s2 + $0x28] sm:$0xff] }
   0x6   :  { %274 = vperm.xlu0 %727, %v255_v9   ;;  %284 = vperm.xlu1 %728, %v257_v10   ;;  %v738_v14 = vld [vmem:[%s1021_s0 + $0x38] sm:$0xff]   ;;  %v261_v17 = vld [vmem:[%s1022_s2 + $0x30] sm:$0xff]  ;;  %v263_v19 = vld [vmem:[%s1022_s2 + $0x40] sm:$0xff] }
   0x7   :  { %705 = vmatpush3.bf16.msra.mxu0 %v730_v2  ;;  %725 = vmatpush3.bf16.msra.mxu1 %v730_v2  ;;  %v262_v18 = vld [vmem:[%s1022_s2 + $0x38] sm:$0xff]  ;;  %v264_v20 = vld [vmem:[%s1022_s2 + $0x48] sm:$0xff]  ;;  %v265_v21 = vld [vmem:[%s1022_s2 + $0x50] sm:$0xff] }
   0x8   :  { %v266_v22 = vld [vmem:[%s1022_s2 + $0x58] sm:$0xff]  ;;  %v267_v23 = vld [vmem:[%s1022_s2 + $0x60] sm:$0xff]  ;;  %v268_v24 = vld [vmem:[%s1022_s2 + $0x68] sm:$0xff] }
   0x9   :  { %v269_v25 = vld [vmem:[%s1022_s2 + $0x70] sm:$0xff]  ;;  %v270_v26 = vld [vmem:[%s1022_s2 + $0x78] sm:$0xff]  ;;  %v867_v36 = vld [vmem:[%s1023_s3] ss:$0 sm:$0xff] }
   0xa   :  { %707 = vmatmul.mubr.msk.bf16.vlgmr.msra.gmra.mrb[0].mxu0 %vm130_vm0, %v733_v5  ;;  %715 = vmatmul.mubr.msk.bf16.vlgmr.msra.gmra.mrb[0].mxu1 %vm130_vm0, %v734_v6 }
   0xb   :  { %710 = vmatprep.mubr.msk.bf16.mxu0 %vm130_vm0, %v735_v7  ;;  %718 = vmatprep.mubr.msk.bf16.mxu1 %vm130_vm0, %v736_v8 }
   0xc   :  { %279 = vperm.xlu0 %727, %v256_v11   ;;  %289 = vperm.xlu1 %728, %v258_v12  }
  0x10   :  { %294 = vperm.xlu0 %727, %v259_v15   ;;  %299 = vperm.xlu1 %728, %v260_v16  }
  0x12   :  { %711 = vmatmul.mubr.msk.bf16.gmra.mrb[4].mxu0 %vm130_vm0, %v737_v13  ;;  %719 = vmatmul.mubr.msk.bf16.gmra.mrb[4].mxu1 %vm130_vm0, %v738_v14 }
  0x14   :  { %304 = vperm.xlu0 %727, %v261_v17   ;;  %309 = vperm.xlu1 %728, %v262_v18  }
  0x18   :  { %314 = vperm.xlu0 %727, %v263_v19   ;;  %319 = vperm.xlu1 %728, %v264_v20  }
  0x1c   :  { %324 = vperm.xlu0 %727, %v265_v21   ;;  %329 = vperm.xlu1 %728, %v266_v22  }
  0x20   :  { %334 = vperm.xlu0 %727, %v267_v23   ;;  %339 = vperm.xlu1 %728, %v268_v24  }
  0x24   :  { %344 = vperm.xlu0 %727, %v269_v25   ;;  %349 = vperm.xlu1 %728, %v270_v26  }
  0x85   :  { %v275_v27 = vpop.permute.xlu0 %274  ;;  %v285_v29 = vpop.permute.xlu1 %284 }
  0x86   :  { %v360_v38 = vadd.f32 %v867_v36, %v285_v29  ;;  %v358_v43 = vadd.f32 %v867_v36, %v275_v27 }
  0x8b   :  { %v280_v28 = vpop.permute.xlu0 %279  ;;  %v290_v31 = vpop.permute.xlu1 %289 }
  0x8c   :  { %v359_v57 = vadd.f32 %v867_v36, %v280_v28  ;;  %v361_v58 = vadd.f32 %v867_v36, %v290_v31 }
  0x8f   :  { %v856_v30 = vpop.permute.xlu0 %294  ;;  %v860_v33 = vpop.permute.xlu1 %299 }
  0x93   :  { %v858_v32 = vpop.permute.xlu0 %304  ;;  %v862_v35 = vpop.permute.xlu1 %309 }
  0x94   :  { %v364_v27 = vadd.f32 %v867_v36, %v858_v32  ;;  %v365_v32 = vadd.f32 %v867_v36, %v862_v35  ;;  %v363_v35 = vadd.f32 %v867_v36, %v860_v33 }
  0x97   :  { %v315_v34 = vpop.permute.xlu0 %314  ;;  %v320_v39 = vpop.permute.xlu1 %319 }
  0x98   :  { %v366_v44 = vadd.f32 %v867_v36, %v315_v34  ;;  %v367_v13 = vadd.f32 %v867_v36, %v320_v39 }
  0x9b   :  { %v325_v37 = vpop.permute.xlu0 %324  ;;  %v330_v59 = vpop.permute.xlu1 %329 }
  0x9c   :  { %v368_v40 = vadd.f32 %v867_v36, %v325_v37  ;;  %v369_v2 = vadd.f32 %v867_v36, %v330_v59 }
  0x9f   :  { %v335_v22 = vpop.permute.xlu0 %334 }
  0xa3   :  { %v345_v28 = vpop.permute.xlu0 %344 }
  0xa4   :  { %v372_v39 = vadd.f32 %v867_v36, %v345_v28 }
  0xdd   :  { %v708_v41 = vpop.f32.mrb[0].mxu0  ;;  %v716_v42 = vpop.f32.mrb[0].mxu1 }
  0xde   :  { %v376_v45 = vadd.f32 %v708_v41, %v360_v38  ;;  %v384_v46 = vadd.f32 %v716_v42, %v368_v40  ;;  %v189_v47 = vpop.f32.mrb[1].mxu0  ;;  %v221_v48 = vpop.f32.mrb[1].mxu1 }
  0xdf   :  { %v709_v49 = vpop.f32.mrb[2].mxu0  ;;  %v717_v50 = vpop.f32.mrb[2].mxu1  ;;  %v374_v53 = vadd.f32 %v358_v43, %v189_v47  ;;  %v382_v54 = vadd.f32 %v366_v44, %v221_v48  ;;  %v362_v44 = vadd.f32 %v867_v36, %v856_v30 }
  0xe0   :  { %v392_v51 = vmax.f32 %v376_v45, 0.0  ;;  %v400_v52 = vmax.f32 %v384_v46, 0.0  ;;  %v192_v55 = vpop.f32.mrb[3].mxu0  ;;  %v224_v56 = vpop.f32.mrb[3].mxu1  ;;  %v377_v62 = vadd.f32 %v709_v49, %v361_v58  ;;  %v385_v8 = vadd.f32 %v717_v50, %v369_v2 }
  0xe1   :  { %v390_v60 = vmax.f32 %v374_v53, 0.0  ;;  %v398_v61 = vmax.f32 %v382_v54, 0.0  ;;  %v375_v63 = vadd.f32 %v359_v57, %v192_v55  ;;  %v383_v15 = vadd.f32 %v367_v13, %v224_v56  ;;  %v340_v38 = vpop.permute.xlu1 %339 }
  0xe2   :  { %572 = vadd.xlane.f32.xlu1 %v400_v52  ;;  %556 = vadd.xlane.f32.xlu0 %v392_v51  ;;  %v393_v7 = vmax.f32 %v377_v62, 0.0  ;;  %v472_v12 = vsub.f32 0.5, %v392_v51  ;;  %v401_v14 = vmax.f32 %v385_v8, 0.0  ;;  %v480_v17 = vsub.f32 0.5, %v400_v52 }
  0xe3   :  { %v391_v9 = vmax.f32 %v375_v63, 0.0  ;;  %v399_v18 = vmax.f32 %v383_v15, 0.0  ;;  %v470_v21 = vsub.f32 0.5, %v390_v60  ;;  %v478_v26 = vsub.f32 0.5, %v398_v61 }
  0xe4   :  { %v488_v16 = vmax.f32 %v472_v12, 0.0  ;;  %v496_v19 = vmax.f32 %v480_v17, 0.0  ;;  %v473_v20 = vsub.f32 0.5, %v393_v7  ;;  %v481_v25 = vsub.f32 0.5, %v401_v14 }
  0xe5   :  { %v712_v0 = vpop.f32.mrb[4].mxu0  ;;  %v720_v1 = vpop.f32.mrb[4].mxu1  ;;  %v486_v24 = vmax.f32 %v470_v21, 0.0  ;;  %v494_v34 = vmax.f32 %v478_v26, 0.0  ;;  %v471_v37 = vsub.f32 0.5, %v391_v9  ;;  %v479_v43 = vsub.f32 0.5, %v399_v18 }
  0xe6   :  { %568 = vadd.xlane.f32.xlu1 %v398_v61  ;;  %v237_v3 = vpop.f32.mrb[5].mxu1  ;;  %552 = vadd.xlane.f32.xlu0 %v390_v60  ;;  %v205_v4 = vpop.f32.mrb[5].mxu0  ;;  %v489_v23 = vmax.f32 %v473_v20, 0.0  ;;  %v380_v29 = vadd.f32 %v712_v0, %v364_v27  ;;  %v497_v31 = vmax.f32 %v481_v25, 0.0  ;;  %v388_v41 = vadd.f32 %v720_v1, %v372_v39 }
  0xe7   :  { %v713_v5 = vpop.f32.mrb[6].mxu0  ;;  %v721_v6 = vpop.f32.mrb[6].mxu1  ;;  %v487_v42 = vmax.f32 %v471_v37, 0.0  ;;  %v378_v47 = vadd.f32 %v362_v44, %v205_v4  ;;  %v495_v49 = vmax.f32 %v479_v43, 0.0  ;;  %v370_v50 = vadd.f32 %v867_v36, %v335_v22 }
  0xe8   :  { %v208_v10 = vpop.f32.mrb[7].mxu0  ;;  %v876_v11 = vpop.f32.mrb[7].mxu1  ;;  %v396_v40 = vmax.f32 %v380_v29, 0.0  ;;  %v404_v46 = vmax.f32 %v388_v41, 0.0  ;;  %v381_v48 = vadd.f32 %v713_v5, %v365_v32  ;;  %v371_v59 = vadd.f32 %v867_v36, %v340_v38 }
  0xe9   :  { %v350_v45 = vpop.permute.xlu1 %349  ;;  %v386_v52 = vadd.f32 %v370_v50, %v237_v3  ;;  %v394_v53 = vmax.f32 %v378_v47, 0.0  ;;  %v379_v57 = vadd.f32 %v363_v35, %v208_v10 }
  0xea   :  { %558 = vadd.xlane.f32.xlu0 %v393_v7  ;;  %554 = vadd.xlane.f32.xlu1 %v391_v9  ;;  %v373_v51 = vadd.f32 %v867_v36, %v350_v45  ;;  %v397_v54 = vmax.f32 %v381_v48, 0.0  ;;  %v476_v58 = vsub.f32 0.5, %v396_v40  ;;  %v387_v61 = vadd.f32 %v371_v59, %v876_v11 }
  0xeb   :  { %v402_v55 = vmax.f32 %v386_v52, 0.0  ;;  %v395_v60 = vmax.f32 %v379_v57, 0.0  ;;  %v474_v63 = vsub.f32 0.5, %v394_v53  ;;  %v484_v5 = vsub.f32 0.5, %v404_v46 }
  0xec   :  { %v389_v30 = vadd.f32 %v721_v6, %v373_v51  ;;  %v492_v62 = vmax.f32 %v476_v58, 0.0  ;;  %v403_v0 = vmax.f32 %v387_v61, 0.0  ;;  %v477_v2 = vsub.f32 0.5, %v397_v54 }
  0xed   :  { %v490_v1 = vmax.f32 %v474_v63, 0.0  ;;  %v482_v33 = vsub.f32 0.5, %v402_v55  ;;  %v475_v6 = vsub.f32 0.5, %v395_v60  ;;  %v500_v36 = vmax.f32 %v484_v5, 0.0 }
  0xee   :  { %574 = vadd.xlane.f32.xlu0 %v401_v14  ;;  %621 = vadd.xlane.f32.xlu1 %v488_v16  ;;  %v405_v56 = vmax.f32 %v389_v30, 0.0  ;;  %v493_v4 = vmax.f32 %v477_v2, 0.0  ;;  %v483_v8 = vsub.f32 0.5, %v403_v0 }
  0xef   :  { %v498_v3 = vmax.f32 %v482_v33, 0.0  ;;  %v491_v7 = vmax.f32 %v475_v6, 0.0 }
  0xf0   :  { %v499_v9 = vmax.f32 %v483_v8, 0.0  ;;  %v485_v10 = vsub.f32 0.5, %v405_v56 }
  0xf2   :  { %570 = vadd.xlane.f32.xlu0 %v399_v18  ;;  %637 = vadd.xlane.f32.xlu1 %v496_v19  ;;  %v501_v11 = vmax.f32 %v485_v10, 0.0 }
  0xf6   :  { %623 = vadd.xlane.f32.xlu0 %v489_v23  ;;  %617 = vadd.xlane.f32.xlu1 %v486_v24 }
  0xfa   :  { %639 = vadd.xlane.f32.xlu0 %v497_v31  ;;  %633 = vadd.xlane.f32.xlu1 %v494_v34 }
  0xfe   :  { %619 = vadd.xlane.f32.xlu0 %v487_v42  ;;  %564 = vadd.xlane.f32.xlu1 %v396_v40 }
 0x102   :  { %635 = vadd.xlane.f32.xlu0 %v495_v49  ;;  %580 = vadd.xlane.f32.xlu1 %v404_v46 }
 0x106   :  { %560 = vadd.xlane.f32.xlu1 %v394_v53  ;;  %566 = vadd.xlane.f32.xlu0 %v397_v54 }
 0x10a   :  { %576 = vadd.xlane.f32.xlu1 %v402_v55  ;;  %582 = vadd.xlane.f32.xlu0 %v405_v56 }
 0x10e   :  { %629 = vadd.xlane.f32.xlu1 %v492_v62  ;;  %562 = vadd.xlane.f32.xlu0 %v395_v60 }
 0x112   :  { %625 = vadd.xlane.f32.xlu1 %v490_v1  ;;  %578 = vadd.xlane.f32.xlu0 %v403_v0 }
 0x116   :  { %641 = vadd.xlane.f32.xlu1 %v498_v3  ;;  %631 = vadd.xlane.f32.xlu0 %v493_v4 }
 0x11a   :  { %645 = vadd.xlane.f32.xlu1 %v500_v36  ;;  %627 = vadd.xlane.f32.xlu0 %v491_v7 }
 0x11e   :  { %643 = vadd.xlane.f32.xlu0 %v499_v9 }
 0x122   :  { %647 = vadd.xlane.f32.xlu0 %v501_v11 }
 0x16f   :  { %v573_v12 = vpop.xlane.xlu1 %572  ;;  %v557_v13 = vpop.xlane.xlu0 %556 }
 0x170   :  { %595 = vst.msk [vmem:[%s1024_s4 + $0x50] sm:$0xff] %vm584_vm1, %v573_v12  ;;  %587 = vst.msk [vmem:[%s1024_s4 + $0x10] sm:$0xff] %vm584_vm1, %v557_v13 }
 0x173   :  { %v569_v14 = vpop.xlane.xlu1 %568  ;;  %v553_v15 = vpop.xlane.xlu0 %552 }
 0x174   :  { %593 = vst.msk [vmem:[%s1024_s4 + $0x40] sm:$0xff] %vm584_vm1, %v569_v14  ;;  %585 = vst.msk [vmem:[%s1024_s4] sm:$0xff] %vm584_vm1, %v553_v15 }
 0x177   :  { %v559_v16 = vpop.xlane.xlu0 %558  ;;  %v555_v17 = vpop.xlane.xlu1 %554 }
 0x178   :  { %588 = vst.msk [vmem:[%s1024_s4 + $0x18] sm:$0xff] %vm584_vm1, %v559_v16  ;;  %586 = vst.msk [vmem:[%s1024_s4 + $0x8] sm:$0xff] %vm584_vm1, %v555_v17 }
 0x17b   :  { %v575_v18 = vpop.xlane.xlu0 %574  ;;  %v622_v19 = vpop.xlane.xlu1 %621 }
 0x17c   :  { %596 = vst.msk [vmem:[%s1024_s4 + $0x58] sm:$0xff] %vm584_vm1, %v575_v18  ;;  %651 = vst.msk [vmem:[%s1025_s5 + $0x10] sm:$0xff] %vm584_vm1, %v622_v19 }
 0x17f   :  { %v571_v20 = vpop.xlane.xlu0 %570  ;;  %v638_v21 = vpop.xlane.xlu1 %637 }
 0x180   :  { %594 = vst.msk [vmem:[%s1024_s4 + $0x48] sm:$0xff] %vm584_vm1, %v571_v20  ;;  %659 = vst.msk [vmem:[%s1025_s5 + $0x50] sm:$0xff] %vm584_vm1, %v638_v21 }
 0x183   :  { %v624_v22 = vpop.xlane.xlu0 %623  ;;  %v618_v23 = vpop.xlane.xlu1 %617 }
 0x184   :  { %652 = vst.msk [vmem:[%s1025_s5 + $0x18] sm:$0xff] %vm584_vm1, %v624_v22  ;;  %649 = vst.msk [vmem:[%s1025_s5] sm:$0xff] %vm584_vm1, %v618_v23 }
 0x187   :  { %v640_v24 = vpop.xlane.xlu0 %639  ;;  %v634_v25 = vpop.xlane.xlu1 %633 }
 0x188   :  { %660 = vst.msk [vmem:[%s1025_s5 + $0x58] sm:$0xff] %vm584_vm1, %v640_v24  ;;  %657 = vst.msk [vmem:[%s1025_s5 + $0x40] sm:$0xff] %vm584_vm1, %v634_v25 }
 0x18b   :  { %v620_v26 = vpop.xlane.xlu0 %619  ;;  %v565_v27 = vpop.xlane.xlu1 %564 }
 0x18c   :  { %650 = vst.msk [vmem:[%s1025_s5 + $0x8] sm:$0xff] %vm584_vm1, %v620_v26  ;;  %591 = vst.msk [vmem:[%s1024_s4 + $0x30] sm:$0xff] %vm584_vm1, %v565_v27 }
 0x18f   :  { %v636_v28 = vpop.xlane.xlu0 %635  ;;  %v581_v29 = vpop.xlane.xlu1 %580 }
 0x190   :  { %658 = vst.msk [vmem:[%s1025_s5 + $0x48] sm:$0xff] %vm584_vm1, %v636_v28  ;;  %599 = vst.msk [vmem:[%s1024_s4 + $0x70] sm:$0xff] %vm584_vm1, %v581_v29 }
 0x193   :  { %v561_v31 = vpop.xlane.xlu1 %560  ;;  %v567_v34 = vpop.xlane.xlu0 %566 }
 0x194   :  { %589 = vst.msk [vmem:[%s1024_s4 + $0x20] sm:$0xff] %vm584_vm1, %v561_v31  ;;  %592 = vst.msk [vmem:[%s1024_s4 + $0x38] sm:$0xff] %vm584_vm1, %v567_v34 }
 0x197   :  { %v577_v37 = vpop.xlane.xlu1 %576  ;;  %v583_v38 = vpop.xlane.xlu0 %582 }
 0x198   :  { %597 = vst.msk [vmem:[%s1024_s4 + $0x60] sm:$0xff] %vm584_vm1, %v577_v37  ;;  %600 = vst.msk [vmem:[%s1024_s4 + $0x78] sm:$0xff] %vm584_vm1, %v583_v38 }
 0x19b   :  { %v630_v39 = vpop.xlane.xlu1 %629  ;;  %v563_v40 = vpop.xlane.xlu0 %562 }
 0x19c   :  { %655 = vst.msk [vmem:[%s1025_s5 + $0x30] sm:$0xff] %vm584_vm1, %v630_v39  ;;  %590 = vst.msk [vmem:[%s1024_s4 + $0x28] sm:$0xff] %vm584_vm1, %v563_v40 }
 0x19f   :  { %v626_v41 = vpop.xlane.xlu1 %625  ;;  %v579_v42 = vpop.xlane.xlu0 %578 }
 0x1a0   :  { %653 = vst.msk [vmem:[%s1025_s5 + $0x20] sm:$0xff] %vm584_vm1, %v626_v41  ;;  %598 = vst.msk [vmem:[%s1024_s4 + $0x68] sm:$0xff] %vm584_vm1, %v579_v42 }
 0x1a3   :  { %v642_v43 = vpop.xlane.xlu1 %641  ;;  %v632_v44 = vpop.xlane.xlu0 %631 }
 0x1a4   :  { %661 = vst.msk [vmem:[%s1025_s5 + $0x60] sm:$0xff] %vm584_vm1, %v642_v43  ;;  %656 = vst.msk [vmem:[%s1025_s5 + $0x38] sm:$0xff] %vm584_vm1, %v632_v44 }
 0x1a7   :  { %v646_v32 = vpop.xlane.xlu1 %645  ;;  %v628_v45 = vpop.xlane.xlu0 %627 }
 0x1a8   :  { %663 = vst.msk [vmem:[%s1025_s5 + $0x70] sm:$0xff] %vm584_vm1, %v646_v32  ;;  %654 = vst.msk [vmem:[%s1025_s5 + $0x28] sm:$0xff] %vm584_vm1, %v628_v45 }
 0x1ab   :  { %v644_v46 = vpop.xlane.xlu0 %643 }
 0x1ac   :  { %662 = vst.msk [vmem:[%s1025_s5 + $0x68] sm:$0xff] %vm584_vm1, %v644_v46 }
 0x1af   :  { %v648_v47 = vpop.xlane.xlu0 %647 }
 0x1b0   :  { %664 = vst.msk [vmem:[%s1025_s5 + $0x78] sm:$0xff] %vm584_vm1, %v648_v47 }

</bundles_post_ra>
